<compile_context>
chip_gen: v7x
topology: tpu7x:2x2x1
jax: 0.10.0
libtpu: 0.0.40
codegen_flags: <defaults>
</compile_context>

<pallas_src>
import functools

import jax
import jax.numpy as jnp
from jax.experimental import pallas as pl
from jax.experimental.pallas import tpu as pltpu


def _smooth_max_kernel(x_ref, o_ref, *, alpha):
    # x_ref: (TILE_B, C, TILE_HW) block in VMEM; reduce over axis=1 (channels).
    x = x_ref[...].astype(jnp.float32)

    # Trace-time branch: skip the scale when alpha == 1.0.
    z = x if alpha == 1.0 else x * alpha

    # Stable softmax weighting: subtracting the per-(batch, pixel) max over C
    # leaves num/den unchanged but keeps exp() finite.
    m = jnp.max(z, axis=1, keepdims=True)            # (TILE_B, 1, TILE_HW)  XLU
    ax = jnp.exp(z - m)                              # EUP

    den = jnp.sum(ax, axis=1)                        # (TILE_B, TILE_HW)
    num = jnp.sum(x * ax, axis=1)                    # (TILE_B, TILE_HW)

    o_ref[...] = (num / den).astype(o_ref.dtype)


def _choose_tiles(B, C, HW, itemsize, budget_bytes=4 << 20):
    """Pick (TILE_B, TILE_HW) so one input block stays within ~4 MiB (Pallas
    double-buffers it), the lane tile is a multiple of 128 (or full HW), and
    the output tile is sublane-dense (8 batch rows when available)."""
    tile_b = B if B < 8 else 8
    tile_hw = HW if HW <= 2048 else 2048             # full dim or 128-multiple

    def block_bytes(thw):
        return tile_b * C * thw * itemsize

    while block_bytes(tile_hw) > budget_bytes and tile_hw > 128:
        next_hw = (tile_hw // 2 // 128) * 128
        tile_hw = max(next_hw, 128)
    return tile_b, tile_hw


def smooth_max(x, alpha=1.0):
    """x: (B, C, H, W) float array. Returns (B, H, W) = smooth max over C."""
    B, C, H, W = x.shape
    HW = H * W
    x_flat = x.reshape(B, C, HW)

    tile_b, tile_hw = _choose_tiles(B, C, HW, jnp.dtype(x.dtype).itemsize)
    grid = (pl.cdiv(B, tile_b), pl.cdiv(HW, tile_hw))

    out_flat = pl.pallas_call(
        functools.partial(_smooth_max_kernel, alpha=float(alpha)),
        out_shape=jax.ShapeDtypeStruct((B, HW), x.dtype),
        grid_spec=pltpu.PrefetchScalarGridSpec(
            num_scalar_prefetch=0,
            grid=grid,
            in_specs=[
                pl.BlockSpec((tile_b, C, tile_hw), lambda b, h: (b, 0, h)),
            ],
            out_specs=pl.BlockSpec((tile_b, tile_hw), lambda b, h: (b, h)),
        ),
        compiler_params=pltpu.CompilerParams(
            dimension_semantics=("parallel", "parallel"),
        ),
    )(x_flat)

    return out_flat.reshape(B, H, W)


def _smooth_max_ref(x, alpha):
    ax = jnp.exp(alpha * x)
    return jnp.sum(x * (ax / jnp.sum(ax, axis=1, keepdims=True)), axis=1)


if __name__ == "__main__":
    key = jax.random.PRNGKey(0)

    # Case 1: the module's canonical small shape (single tile).
    B, C, H, W = 2, 4, 16, 16
    x1 = jax.random.normal(key, (B, C, H, W), dtype=jnp.float32)
    out1 = jax.block_until_ready(smooth_max(x1, alpha=1.0))
    ref1 = _smooth_max_ref(x1, 1.0)
    assert out1.shape == (B, H, W)
    assert jnp.allclose(out1, ref1, atol=1e-5, rtol=1e-5)

    # Case 2: exercises the (batch-tile x lane-tile) grid: B=8 rows per output
    # tile (sublane-dense stores), HW=4096 -> two 2048-lane tiles, alpha != 1.
    B2, C2, H2, W2 = 8, 4, 64, 64
    x2 = jax.random.normal(jax.random.PRNGKey(1), (B2, C2, H2, W2),
                           dtype=jnp.float32)
    out2 = jax.block_until_ready(smooth_max(x2, alpha=2.0))
    ref2 = _smooth_max_ref(x2, 2.0)
    assert out2.shape == (B2, H2, W2)
    assert jnp.allclose(out2, ref2, atol=1e-5, rtol=1e-5)

    print("KERNEL_OK")
</pallas_src>

<mosaic_0001>
module attributes {stable_mosaic.version = 11 : i64} {
  func.func @_smooth_max_kernel(%arg0: i32, %arg1: i32, %arg2: memref<2x4x256xf32, #tpu.memory_space<vmem>>, %arg3: memref<2x256xf32, #tpu.memory_space<vmem>>) attributes {dimension_semantics = [#tpu.dimension_semantics<parallel>, #tpu.dimension_semantics<parallel>], iteration_bounds = array<i64: 1, 1>, scalar_prefetch = 0 : i64, scratch_operands = 0 : i64, tpu.core_type = #tpu.core_type<tc>, window_params = [{transform_indices = @transform_0, window_bounds = array<i64: 2, 4, 256>}, {transform_indices = @transform_1, window_bounds = array<i64: 2, 256>}]} {
    %c0 = arith.constant 0 : index
    %c0_0 = arith.constant 0 : index
    %c0_1 = arith.constant 0 : index
    %0 = vector.load %arg2[%c0, %c0_0, %c0_1] : memref<2x4x256xf32, #tpu.memory_space<vmem>>, vector<2x4x256xf32>
    %cst = arith.constant dense<0xFF800000> : vector<2x256xf32>
    %1 = vector.multi_reduction <maximumf>, %0, %cst [1] : vector<2x4x256xf32> to vector<2x256xf32>
    %2 = vector.shape_cast %1 : vector<2x256xf32> to vector<2x1x256xf32>
    %3 = vector.broadcast %2 : vector<2x1x256xf32> to vector<2x4x256xf32>
    %4 = arith.subf %0, %3 : vector<2x4x256xf32>
    %5 = math.exp %4 : vector<2x4x256xf32>
    %cst_2 = arith.constant dense<0.000000e+00> : vector<2x256xf32>
    %6 = vector.multi_reduction <add>, %5, %cst_2 [1] : vector<2x4x256xf32> to vector<2x256xf32>
    %7 = arith.mulf %0, %5 : vector<2x4x256xf32>
    %cst_3 = arith.constant dense<0.000000e+00> : vector<2x256xf32>
    %8 = vector.multi_reduction <add>, %7, %cst_3 [1] : vector<2x4x256xf32> to vector<2x256xf32>
    %9 = arith.divf %8, %6 : vector<2x256xf32>
    %c0_4 = arith.constant 0 : index
    %c0_5 = arith.constant 0 : index
    %10 = vector.load %arg3[%c0_4, %c0_5] : memref<2x256xf32, #tpu.memory_space<vmem>>, vector<2x256xf32>
    tpu.vector_store %arg3[%c0_4, %c0_5], %9 {strides = array<i32>} : memref<2x256xf32, #tpu.memory_space<vmem>>, vector<2x256xf32>,
    return
  }
  func.func @transform_0(%arg0: i32, %arg1: i32) -> (i32, i32, i32) {
    %c0_i32 = arith.constant 0 : i32
    %c0_i32_0 = arith.constant 0 : i32
    return %arg0, %c0_i32, %arg1 : i32, i32, i32
  }
  func.func @transform_1(%arg0: i32, %arg1: i32) -> (i32, i32) {
    %c0_i32 = arith.constant 0 : i32
    return %arg0, %arg1 : i32, i32
  }
}

</mosaic_0001>

<bundles_post_ra>
// kernel: tpu_custom_call.1
= control target key start
LH: loop header
LB: loop body
LE: loop exit
PB: predicated region body
PF: predicated region fallthrough
CT: control target
= control target key end

     0   :  { %6 = vsyncpa [#allocation3], 0  ;;  %s320_s0 = inlined_call_operand.hbm [shape: f32[2,4,256], index: 0, kind: input, shape index: {}]   ;;  %s321_s1 = inlined_call_operand.hbm [shape: f32[2,256], index: 1, kind: output, shape index: {}]  }
   0x1   :  { %7 = vsyncpa [#allocation4], 0  ;;  %s269_s6 = smov [#allocation2]   ;;  %s221_s10 = scalar_lea.hbm %s320_s0, 256 }
   0x2   :  { %s13_s7 = sshll.u32 %s269_s6, 4  ;;  %p222_p0 = scmp.ne.s32.totalorder %s320_s0, %s221_s10  ;;  %s14_s7 = int_to_ptr.vmem [resolvable:$true] %s13_s7 }
   0x3   :  { %p225_p1 = scmp.lt.u32.totalorder %s221_s10, %s320_s0 }
   0x5   :  { %p227_p2 = pnand %p225_p1, %p222_p0 }
   0x7   :  { %230 = shalt.err (!%p227_p2)
}
   0x8   :  { %s231_s15 = scalar_lea.vmem %s14_s7, 256  ;;  %p236_p4 = scmp.lt.s32.totalorder %s14_s7, %s14_s7 }
   0x9   :  { %p232_p3 = scmp.ne.s32.totalorder %s14_s7, %s231_s15  ;;  %p237_p5 = scmp.lt.s32.totalorder %s231_s15, %s231_s15 }
   0xb   :  { %p238_p6 = por %p237_p5, %p236_p4 }
   0xd   :  { %p239_p7 = pnand %p238_p6, %p232_p3 }
   0xf   :  { %242 = shalt.err (!%p239_p7)
}
  0x10   :  { %s270_s16 = smov 128   ;;  %s271_s17 = smov 8  }
  0x11   :  { %19 = dma.hbm_to_vmem [thread:$0]  %s320_s0, 256, %s14_s7, [#allocation3], %s270_s16, %s270_s16, %s271_s17  }
  0x12   :  { %265 = dma.done.wait [#allocation3], 256  }
  0x13   :  { %266 = vsyncadd [#allocation3], 4294967040  ;;  %vm31_vm0 = vcmask 1043456   ;;  %v23_v0 = vld [vmem:[#allocation2] sm:$0xff]  ;;  %v24_v1 = vld [vmem:[#allocation2 + $0x8] sm:$0xff]  ;;  %vm177_vm1 = vcmask 1041409  }
  0x14   :  { %v27_v2 = vcombine.high %v23_v0, %v23_v0  ;;  %v32_v3 = vsel %vm31_vm0, %v23_v0, -inf  ;;  %v28_v4 = vcombine.high %v24_v1, %v24_v1  ;;  %v46_v5 = vsel %vm31_vm0, %v24_v1, -inf  ;;  %s273_s0 = smov [#allocation5]  }
  0x15   :  { %v33_v6 = vrot.slane %v32_v3, 4  ;;  %v47_v7 = vrot.slane %v46_v5, 4  ;;  %vm179_vm2 = vcmask 1043459   ;;  %vm181_vm3 = vcmask 1045509   ;;  %s193_s20 = sshll.u32 %s273_s0, 4  ;;  %s194_s20 = int_to_ptr.vmem [resolvable:$true] %s193_s20 }
  0x16   :  { %v39_v8 = vsel %vm31_vm0, %v27_v2, -inf  ;;  %v53_v9 = vsel %vm31_vm0, %v28_v4, -inf  ;;  %vm183_vm4 = vcmask 1047559   ;;  %s243_s21 = scalar_lea.vmem %s194_s20, 64  ;;  %p248_p9 = scmp.lt.s32.totalorder %s194_s20, %s194_s20 }
  0x17   :  { %v34_v10 = vmax.f32 %v32_v3, %v33_v6  ;;  %v40_v11 = vrot.slane %v39_v8, 4  ;;  %v48_v12 = vmax.f32 %v46_v5, %v47_v7  ;;  %v54_v13 = vrot.slane %v53_v9, 4  ;;  %p244_p8 = scmp.ne.s32.totalorder %s194_s20, %s243_s21  ;;  %p249_p10 = scmp.lt.s32.totalorder %s243_s21, %s243_s21 }
  0x19   :  { %v35_v14 = vrot.slane %v34_v10, 2  ;;  %v41_v15 = vmax.f32 %v39_v8, %v40_v11  ;;  %v49_v16 = vrot.slane %v48_v12, 2  ;;  %v55_v17 = vmax.f32 %v53_v9, %v54_v13  ;;  %p250_p11 = por %p249_p10, %p248_p9 }
  0x1b   :  { %v36_v18 = vmax.f32 %v34_v10, %v35_v14  ;;  %v42_v19 = vrot.slane %v41_v15, 2  ;;  %v50_v20 = vmax.f32 %v48_v12, %v49_v16  ;;  %v56_v21 = vrot.slane %v55_v17, 2  ;;  %p251_p12 = pnand %p250_p11, %p244_p8 }
  0x1d   :  { %v37_v22 = vrot.slane %v36_v18, 1  ;;  %v43_v23 = vmax.f32 %v41_v15, %v42_v19  ;;  %v51_v24 = vrot.slane %v50_v20, 1  ;;  %v57_v25 = vmax.f32 %v55_v17, %v56_v21 }
  0x1f   :  { %v38_v26 = vmax.f32 %v36_v18, %v37_v22  ;;  %v44_v27 = vrot.slane %v43_v23, 1  ;;  %v52_v28 = vmax.f32 %v50_v20, %v51_v24  ;;  %v58_v29 = vrot.slane %v57_v25, 1 }
  0x21   :  { %v45_v30 = vmax.f32 %v43_v23, %v44_v27  ;;  %v59_v31 = vmax.f32 %v57_v25, %v58_v29 }
  0x23   :  { %v64_v32 = vcombine.low %v38_v26, %v45_v30  ;;  %v65_v33 = vcombine.low %v52_v28, %v59_v31 }
  0x25   :  { %v68_v34 = vsub.f32 %v23_v0, %v64_v32  ;;  %v69_v35 = vsub.f32 %v24_v1, %v65_v33 }
  0x27   :  { %v70_v36 = vmul.f32 1.442695, %v68_v34  ;;  %v72_v37 = vmul.f32 1.442695, %v69_v35  ;;  %v272_v34 = vmov 1983009808  }
  0x28   :  { %v158_v35 = vunpack.c.l.s4 %v272_v34 }
  0x29   :  { %209 = vpow2.f32 %v70_v36  ;;  %v160_v36 = vlaneseq }
  0x2a   :  { %211 = vpow2.f32 %v72_v37 }
  0x33   :  { %v210_v38 = vpop.eup %209 }
  0x34   :  { %v212_v39 = vpop.eup %211  ;;  %v76_v40 = vcombine.high %v210_v38, %v210_v38  ;;  %v80_v41 = vsel %vm31_vm0, %v210_v38, 0.0  ;;  %v108_v42 = vmul.f32 %v210_v38, %v23_v0 }
  0x35   :  { %v77_v43 = vcombine.high %v212_v39, %v212_v39  ;;  %v81_v44 = vrot.slane %v80_v41, 4  ;;  %v94_v45 = vsel %vm31_vm0, %v212_v39, 0.0  ;;  %v109_v46 = vmul.f32 %v212_v39, %v24_v1 }
  0x36   :  { %v87_v47 = vsel %vm31_vm0, %v76_v40, 0.0  ;;  %v95_v48 = vrot.slane %v94_v45, 4  ;;  %v112_v49 = vcombine.high %v108_v42, %v108_v42  ;;  %v116_v50 = vsel %vm31_vm0, %v108_v42, 0.0 }
  0x37   :  { %v82_v51 = vadd.f32 %v81_v44, %v80_v41  ;;  %v88_v52 = vrot.slane %v87_v47, 4  ;;  %v101_v53 = vsel %vm31_vm0, %v77_v43, 0.0  ;;  %v113_v54 = vcombine.high %v109_v46, %v109_v46 }
  0x38   :  { %v96_v55 = vadd.f32 %v95_v48, %v94_v45  ;;  %v102_v56 = vrot.slane %v101_v53, 4  ;;  %v117_v57 = vrot.slane %v116_v50, 4  ;;  %v123_v58 = vsel %vm31_vm0, %v112_v49, 0.0 }
  0x39   :  { %v83_v59 = vrot.slane %v82_v51, 2  ;;  %v89_v60 = vadd.f32 %v88_v52, %v87_v47  ;;  %v124_v61 = vrot.slane %v123_v58, 4  ;;  %v130_v62 = vsel %vm31_vm0, %v109_v46, 0.0 }
  0x3a   :  { %v97_v63 = vrot.slane %v96_v55, 2  ;;  %v103_v0 = vadd.f32 %v102_v56, %v101_v53  ;;  %v118_v1 = vadd.f32 %v117_v57, %v116_v50  ;;  %v131_v2 = vrot.slane %v130_v62, 4 }
  0x3b   :  { %v84_v3 = vadd.f32 %v83_v59, %v82_v51  ;;  %v90_v4 = vrot.slane %v89_v60, 2  ;;  %v125_v5 = vadd.f32 %v124_v61, %v123_v58  ;;  %v137_v6 = vsel %vm31_vm0, %v113_v54, 0.0 }
  0x3c   :  { %v98_v7 = vadd.f32 %v97_v63, %v96_v55  ;;  %v104_v8 = vrot.slane %v103_v0, 2  ;;  %v119_v9 = vrot.slane %v118_v1, 2  ;;  %v132_v10 = vadd.f32 %v131_v2, %v130_v62 }
  0x3d   :  { %v85_v11 = vrot.slane %v84_v3, 1  ;;  %v91_v12 = vadd.f32 %v90_v4, %v89_v60  ;;  %v138_v13 = vrot.slane %v137_v6, 4  ;;  %v126_v16 = vrot.slane %v125_v5, 2 }
  0x3e   :  { %v99_v14 = vrot.slane %v98_v7, 1  ;;  %v105_v15 = vadd.f32 %v104_v8, %v103_v0  ;;  %v133_v17 = vrot.slane %v132_v10, 2  ;;  %v120_v23 = vadd.f32 %v119_v9, %v118_v1 }
  0x3f   :  { %v86_v18 = vadd.f32 %v85_v11, %v84_v3  ;;  %v92_v19 = vrot.slane %v91_v12, 1  ;;  %v139_v20 = vadd.f32 %v138_v13, %v137_v6  ;;  %v127_v28 = vadd.f32 %v126_v16, %v125_v5 }
  0x40   :  { %v100_v21 = vadd.f32 %v99_v14, %v98_v7  ;;  %v106_v22 = vrot.slane %v105_v15, 1  ;;  %v134_v25 = vadd.f32 %v133_v17, %v132_v10  ;;  %v121_v30 = vrot.slane %v120_v23, 1 }
  0x41   :  { %v93_v24 = vadd.f32 %v92_v19, %v91_v12  ;;  %v140_v26 = vrot.slane %v139_v20, 2  ;;  %213 = vrcp.f32 %v86_v18  ;;  %v128_v32 = vrot.slane %v127_v28, 1 }
  0x42   :  { %v107_v27 = vadd.f32 %v106_v22, %v105_v15  ;;  %215 = vrcp.f32 %v100_v21  ;;  %v135_v31 = vrot.slane %v134_v25, 1  ;;  %v122_v37 = vadd.f32 %v121_v30, %v120_v23 }
  0x43   :  { %v141_v29 = vadd.f32 %v140_v26, %v139_v20  ;;  %217 = vrcp.f32 %v93_v24  ;;  %v129_v39 = vadd.f32 %v128_v32, %v127_v28  ;;  %v159_v42 = vunpack.c.0.s8 %v158_v35 }
  0x44   :  { %219 = vrcp.f32 %v107_v27  ;;  %v136_v38 = vadd.f32 %v135_v31, %v134_v25  ;;  %v161_v43 = vshrl.u32 %v160_v36, 7 }
  0x45   :  { %v142_v33 = vrot.slane %v141_v29, 1 }
  0x46   :  { %v162_v51 = vsub.s32 %v159_v42, %v161_v43 }
  0x47   :  { %v143_v41 = vadd.f32 %v142_v33, %v141_v29 }
  0x4b   :  { %v214_v40 = vpop.eup %213 }
  0x4c   :  { %v216_v44 = vpop.eup %215  ;;  %v145_v45 = vmul.f32 %v214_v40, %v122_v37 }
  0x4d   :  { %v218_v46 = vpop.eup %217  ;;  %v149_v47 = vmul.f32 %v216_v44, %v136_v38 }
  0x4e   :  { %v220_v48 = vpop.eup %219  ;;  %v147_v49 = vmul.f32 %v218_v46, %v129_v39 }
  0x4f   :  { %v151_v50 = vmul.f32 %v220_v48, %v143_v41 }
  0x50   :  { %v156_v52 = vcombine.low %v145_v45, %v147_v49 }
  0x51   :  { %v164_v53 = vcombine.low %v149_v47, %v151_v50 }
  0x52   :  { %v163_v54 = vrot.slane %v156_v52, %v162_v51 }
  0x53   :  { %v171_v55 = vrot.slane %v164_v53, %v162_v51 }
  0x55   :  { %v176_v56 = vrot.slane %v171_v55, 7 }
  0x57   :  { %v178_v57 = vsel %vm177_vm1, %v176_v56, %v163_v54 }
  0x58   :  { %v180_v58 = vsel %vm179_vm2, %v176_v56, %v178_v57 }
  0x59   :  { %v182_v59 = vsel %vm181_vm3, %v176_v56, %v180_v58 }
  0x5a   :  { %v184_v60 = vsel %vm183_vm4, %v176_v56, %v182_v59 }
  0x5b   :  { %186 = vst [vmem:[#allocation5] sm:$0xf] %v184_v60 }
  0x5c   :  { %254 = shalt.err (!%p251_p12)
}
  0x5d   :  { %s255_s24 = scalar_lea.hbm %s321_s1, 64 }
  0x5e   :  { %p256_p13 = scmp.ne.s32.totalorder %s321_s1, %s255_s24  ;;  %p259_p0 = scmp.lt.u32.totalorder %s255_s24, %s321_s1 }
  0x60   :  { %p261_p1 = pnand %p259_p0, %p256_p13 }
  0x62   :  { %264 = shalt.err (!%p261_p1)
}
  0x63   :  { %196 = dma.vmem_to_hbm [thread:$0]  %s194_s20, 64, %s321_s1, [#allocation4]  }
  0x64   :  { %267 = dma.done.wait [#allocation4], 64  }
  0x65   :  { %268 = vsyncadd [#allocation4], 4294967232 }
  0x66   :  { %200 = vsyncpa [#allocation3], 1 }
  0x67   :  { %201 = vsyncpa [#allocation4], 1 }

</bundles_post_ra>
